<compile_context>
chip_gen: v5e
topology: v5e:2x2
jax: 0.10.0
libtpu: 0.0.40
codegen_flags: <defaults>
</compile_context>

<pallas_src>
import functools

import jax
import jax.numpy as jnp
import numpy as np
from jax.experimental import pallas as pl
from jax.experimental.pallas import tpu as pltpu


def _round_up(x, m):
    return ((x + m - 1) // m) * m


def _mlp_sigmoid(avg, mx, w1, w2):
    """sigmoid(W2 relu(W1 avg) + W2 relu(W1 mx)); avg/mx: (C,1)."""
    def mlp(v):
        h = jnp.maximum(jnp.dot(w1, v, preferred_element_type=jnp.float32), 0.0)
        return jnp.dot(w2, h, preferred_element_type=jnp.float32)
    return jax.nn.sigmoid(mlp(avg) + mlp(mx))


# ---------------------------------------------------------------------------
# Fused single-pass kernel: pool + MLP + sigmoid + scale, one block per batch.
# ---------------------------------------------------------------------------
def _fused_kernel(x_ref, w1_ref, w2_ref, o_ref, *, hw_true):
    x = x_ref[0].astype(jnp.float32)                       # (C, HW)
    avg = jnp.sum(x, axis=-1, keepdims=True) * (1.0 / hw_true)
    mx = jnp.max(x, axis=-1, keepdims=True)
    scale = _mlp_sigmoid(avg, mx,
                         w1_ref[...].astype(jnp.float32),
                         w2_ref[...].astype(jnp.float32))  # (C, 1)
    o_ref[0] = (scale * x).astype(o_ref.dtype)


# ---------------------------------------------------------------------------
# Pass 1 (two-pass path): per-channel avg/max pooling (+ MLP on last tile).
# ---------------------------------------------------------------------------
def _reduce_kernel(x_ref, w1_ref, w2_ref, scale_ref, sum_sc, max_sc, *,
                   hw_true, lane_tile, needs_mask):
    t = pl.program_id(1)

    @pl.when(t == 0)
    def _():
        sum_sc[...] = jnp.zeros_like(sum_sc)
        max_sc[...] = jnp.full_like(max_sc, -jnp.inf)

    # (C, T); accumulate in f32 regardless of the storage dtype.
    x = x_ref[0].astype(jnp.float32)
    if needs_mask:
        # Partial edge tile: lanes past the true spatial extent carry
        # unspecified data -> mask them (0 for sum, -inf for max).
        lane = jax.lax.broadcasted_iota(jnp.int32, x.shape, 1)
        valid = (t * lane_tile + lane) < hw_true
        x_sum = jnp.where(valid, x, 0.0)
        x_max = jnp.where(valid, x, -jnp.inf)
    else:
        x_sum = x
        x_max = x
    sum_sc[...] += jnp.sum(x_sum, axis=-1, keepdims=True)
    max_sc[...] = jnp.maximum(max_sc[...],
                              jnp.max(x_max, axis=-1, keepdims=True))

    @pl.when(t == pl.num_programs(1) - 1)
    def _():
        avg = sum_sc[...] * (1.0 / hw_true)
        scale_ref[0] = _mlp_sigmoid(
            avg, max_sc[...],
            w1_ref[...].astype(jnp.float32),
            w2_ref[...].astype(jnp.float32)).astype(scale_ref.dtype)


# ---------------------------------------------------------------------------
# Pass 2 (two-pass path): broadcast-multiply (pure HBM stream).
# ---------------------------------------------------------------------------
def _scale_kernel(scale_ref, x_ref, o_ref):
    o_ref[0] = (scale_ref[0].astype(jnp.float32) *
                x_ref[0].astype(jnp.float32)).astype(o_ref.dtype)


def channel_attention(x_nchw, w1, w2, *, lane_tile=None, force_two_pass=False):
    """Channel attention forward. x: (B, C, H, W); w1: (C//r, C); w2: (C, C//r)."""
    B, C, H, W = x_nchw.shape
    HW = H * W
    dtype = x_nchw.dtype
    itemsize = jnp.dtype(dtype).itemsize

    x = x_nchw.reshape(B, C, HW)                 # free (contiguous), no copy
    w_bytes = int(w1.size * w1.dtype.itemsize + w2.size * w2.dtype.itemsize)

    def vmem_limit(nbytes):
        # Explicit scoped-VMEM budget: footprint + headroom, clamped to a
        # value that is safe across v5e / v6e / v7x.
        return int(min(32 << 20, max(nbytes + (2 << 20), 8 << 20)))

    # ---- fused single-pass path: read x once, write once (2x traffic) ----
    slab_f32 = C * HW * 4
    slab = C * HW * itemsize
    use_fused = (not force_two_pass) and lane_tile is None and slab_f32 <= (4 << 20)
    if use_fused:
        out = pl.pallas_call(
            functools.partial(_fused_kernel, hw_true=HW),
            out_shape=jax.ShapeDtypeStruct((B, C, HW), dtype),
            grid_spec=pltpu.PrefetchScalarGridSpec(
                num_scalar_prefetch=0,
                grid=(B,),
                in_specs=[
                    pl.BlockSpec((1, C, HW), lambda b: (b, 0, 0)),
                    pl.BlockSpec(w1.shape, lambda b: (0, 0)),
                    pl.BlockSpec(w2.shape, lambda b: (0, 0)),
                ],
                out_specs=pl.BlockSpec((1, C, HW), lambda b: (b, 0, 0)),
            ),
            compiler_params=pltpu.CompilerParams(
                dimension_semantics=("parallel",),
                vmem_limit_bytes=vmem_limit(4 * slab + 2 * slab_f32 + 2 * w_bytes)),
        )(x, w1, w2)
        return out.reshape(B, C, H, W)

    # ---- two-pass streaming path ----
    # Spatial tile: lane-dense, ~2 MiB per block so per-step overhead is
    # amortized while (3 in + 2 out) buffers stay well inside scoped VMEM.
    if lane_tile is None:
        budget_per_block = 2 << 20
        lanes = max(128, (budget_per_block // max(C * itemsize, 1)) // 128 * 128)
        lane_tile = HW if HW <= lanes else lanes   # full-extent block if small
    assert lane_tile == HW or lane_tile % 128 == 0, \
        "lane_tile must be a multiple of 128 (or the full spatial extent)"
    T = lane_tile
    NT = pl.cdiv(HW, T)
    needs_mask = (HW % T) != 0
    block_bytes = C * T * itemsize
    # TODO(synk): extremely large C (C * 128 * itemsize >> a few MiB) would
    # additionally need channel tiling; not needed for realistic CA blocks.

    # pass 1: pooled reduction + MLP + sigmoid -> scale (B, C, 1)
    scale = pl.pallas_call(
        functools.partial(_reduce_kernel, hw_true=HW, lane_tile=T,
                          needs_mask=needs_mask),
        out_shape=jax.ShapeDtypeStruct((B, C, 1), jnp.float32),
        grid_spec=pltpu.PrefetchScalarGridSpec(
            num_scalar_prefetch=0,
            grid=(B, NT),
            in_specs=[
                pl.BlockSpec((1, C, T), lambda b, t: (b, 0, t)),
                pl.BlockSpec(w1.shape, lambda b, t: (0, 0)),
                pl.BlockSpec(w2.shape, lambda b, t: (0, 0)),
            ],
            out_specs=pl.BlockSpec((1, C, 1), lambda b, t: (b, 0, 0)),
            scratch_shapes=[pltpu.VMEM((C, 1), jnp.float32),
                            pltpu.VMEM((C, 1), jnp.float32)],
        ),
        compiler_params=pltpu.CompilerParams(
            dimension_semantics=("parallel", "arbitrary"),
            vmem_limit_bytes=vmem_limit(2 * block_bytes + 2 * w_bytes)),
    )(x, w1, w2)

    # pass 2: out = scale * x (streaming, both grid axes parallel)
    n_in_buf = 2
    if NT >= 3:
        # Pure stream: triple-buffer the input so the next tile's DMA latency
        # never peeks out.
        n_in_buf = 3
        x_spec = pl.BlockSpec((1, C, T), lambda b, t: (b, 0, t),
                              pipeline_mode=pl.Buffered(3))
    else:
        x_spec = pl.BlockSpec((1, C, T), lambda b, t: (b, 0, t))

    out = pl.pallas_call(
        _scale_kernel,
        out_shape=jax.ShapeDtypeStruct((B, C, HW), dtype),
        grid_spec=pltpu.PrefetchScalarGridSpec(
            num_scalar_prefetch=0,
            grid=(B, NT),
            in_specs=[
                pl.BlockSpec((1, C, 1), lambda b, t: (b, 0, 0)),
                x_spec,
            ],
            out_specs=pl.BlockSpec((1, C, T), lambda b, t: (b, 0, t)),
        ),
        compiler_params=pltpu.CompilerParams(
            dimension_semantics=("parallel", "parallel"),
            vmem_limit_bytes=vmem_limit((n_in_buf + 2) * block_bytes)),
    )(scale, x)

    return out.reshape(B, C, H, W)


def channel_attention_ref(x, w1, w2):
    # Pure-JAX reference matching the PyTorch forward.
    avg = jnp.mean(x, axis=(2, 3))                          # (B, C)
    mx = jnp.max(x, axis=(2, 3))                            # (B, C)

    def mlp(v):
        h = jnp.maximum(v @ w1.T, 0.0)                      # (B, C//r)
        return h @ w2.T                                     # (B, C)

    w = jax.nn.sigmoid(mlp(avg) + mlp(mx))                  # (B, C)
    return w[:, :, None, None] * x


if __name__ == "__main__":
    key = jax.random.PRNGKey(0)
    ratio = 8

    configs = [
        # (shape, forced lane_tile, force_two_pass)
        ((2, 16, 16, 16), None, False),  # fused single-pass path (HW=256)
        ((2, 16, 20, 20), None, False),  # fused path, non-128-aligned HW=400
        ((2, 16, 16, 16), 128, True),    # two-pass, HW divisible by tile
        ((2, 16, 20, 20), 128, True),    # two-pass, partial edge tile (mask)
    ]
    for (B, C, H, W), tile, two_pass in configs:
        mid = C // ratio
        kx, k1, k2 = jax.random.split(jax.random.fold_in(key, H * W + B), 3)
        x = jax.random.normal(kx, (B, C, H, W), dtype=jnp.float32)
        # Deterministic synthetic weights for the two 1x1 convs (no bias).
        w1 = jax.random.normal(k1, (mid, C), dtype=jnp.float32) * 0.2
        w2 = jax.random.normal(k2, (C, mid), dtype=jnp.float32) * 0.2

        out = channel_attention(x, w1, w2, lane_tile=tile,
                                force_two_pass=two_pass)
        out = jax.block_until_ready(out)
        ref = channel_attention_ref(x, w1, w2)
        np.testing.assert_allclose(np.asarray(out), np.asarray(ref),
                                   rtol=1e-5, atol=1e-5)

    print("KERNEL_OK")
</pallas_src>

<mosaic_0001>
module attributes {stable_mosaic.version = 11 : i64} {
  func.func @_fused_kernel(%arg0: i32, %arg1: memref<1x16x256xf32, #tpu.memory_space<vmem>>, %arg2: memref<2x16xf32, #tpu.memory_space<vmem>>, %arg3: memref<16x2xf32, #tpu.memory_space<vmem>>, %arg4: memref<1x16x256xf32, #tpu.memory_space<vmem>>) attributes {dimension_semantics = [#tpu.dimension_semantics<parallel>], iteration_bounds = array<i64: 2>, scalar_prefetch = 0 : i64, scratch_operands = 0 : i64, tpu.core_type = #tpu.core_type<tc>, window_params = [{transform_indices = @transform_0, window_bounds = array<i64: 1, 16, 256>}, {pipeline_mode = #tpu.pipeline_mode<synchronous>, transform_indices = @transform_1, window_bounds = array<i64: 2, 16>}, {pipeline_mode = #tpu.pipeline_mode<synchronous>, transform_indices = @transform_2, window_bounds = array<i64: 16, 2>}, {transform_indices = @transform_3, window_bounds = array<i64: 1, 16, 256>}]} {
    %c0 = arith.constant 0 : index
    %c0_0 = arith.constant 0 : index
    %c0_1 = arith.constant 0 : index
    %0 = vector.load %arg1[%c0, %c0_0, %c0_1] : memref<1x16x256xf32, #tpu.memory_space<vmem>>, vector<1x16x256xf32>
    %1 = vector.shape_cast %0 : vector<1x16x256xf32> to vector<16x256xf32>
    %cst = arith.constant dense<0.000000e+00> : vector<16xf32>
    %2 = vector.multi_reduction <add>, %1, %cst [1] : vector<16x256xf32> to vector<16xf32>
    %3 = vector.shape_cast %2 : vector<16xf32> to vector<16x1xf32>
    %cst_2 = arith.constant 3.906250e-03 : f32
    %4 = vector.broadcast %cst_2 : f32 to vector<16x1xf32>
    %5 = arith.mulf %3, %4 : vector<16x1xf32>
    %cst_3 = arith.constant dense<0xFF800000> : vector<16xf32>
    %6 = vector.multi_reduction <maximumf>, %1, %cst_3 [1] : vector<16x256xf32> to vector<16xf32>
    %7 = vector.shape_cast %6 : vector<16xf32> to vector<16x1xf32>
    %c0_4 = arith.constant 0 : index
    %c0_5 = arith.constant 0 : index
    %8 = vector.load %arg2[%c0_4, %c0_5] : memref<2x16xf32, #tpu.memory_space<vmem>>, vector<2x16xf32>
    %c0_6 = arith.constant 0 : index
    %c0_7 = arith.constant 0 : index
    %9 = vector.load %arg3[%c0_6, %c0_7] : memref<16x2xf32, #tpu.memory_space<vmem>>, vector<16x2xf32>
    %cst_8 = arith.constant dense<0.000000e+00> : vector<2x1xf32>
    %10 = tpu.matmul %8, %5, %cst_8 {dimension_numbers = #tpu.dot_dimension_numbers<[1], [0], [0], [1], [0, 0, 1, 1], [], []>} : vector<2x16xf32>, vector<16x1xf32>, vector<2x1xf32> -> vector<2x1xf32>
    %cst_9 = arith.constant 0.000000e+00 : f32
    %11 = vector.broadcast %cst_9 : f32 to vector<2x1xf32>
    %12 = arith.maximumf %10, %11 : vector<2x1xf32>
    %cst_10 = arith.constant dense<0.000000e+00> : vector<16x1xf32>
    %13 = tpu.matmul %9, %12, %cst_10 {dimension_numbers = #tpu.dot_dimension_numbers<[1], [0], [0], [1], [0, 0, 1, 1], [], []>} : vector<16x2xf32>, vector<2x1xf32>, vector<16x1xf32> -> vector<16x1xf32>
    %cst_11 = arith.constant dense<0.000000e+00> : vector<2x1xf32>
    %14 = tpu.matmul %8, %7, %cst_11 {dimension_numbers = #tpu.dot_dimension_numbers<[1], [0], [0], [1], [0, 0, 1, 1], [], []>} : vector<2x16xf32>, vector<16x1xf32>, vector<2x1xf32> -> vector<2x1xf32>
    %cst_12 = arith.constant 0.000000e+00 : f32
    %15 = vector.broadcast %cst_12 : f32 to vector<2x1xf32>
    %16 = arith.maximumf %14, %15 : vector<2x1xf32>
    %cst_13 = arith.constant dense<0.000000e+00> : vector<16x1xf32>
    %17 = tpu.matmul %9, %16, %cst_13 {dimension_numbers = #tpu.dot_dimension_numbers<[1], [0], [0], [1], [0, 0, 1, 1], [], []>} : vector<16x2xf32>, vector<2x1xf32>, vector<16x1xf32> -> vector<16x1xf32>
    %18 = arith.addf %13, %17 : vector<16x1xf32>
    %19 = arith.negf %18 : vector<16x1xf32>
    %20 = math.exp %19 : vector<16x1xf32>
    %cst_14 = arith.constant 1.000000e+00 : f32
    %21 = vector.broadcast %cst_14 : f32 to vector<16x1xf32>
    %22 = arith.addf %21, %20 : vector<16x1xf32>
    %23 = arith.divf %21, %22 : vector<16x1xf32>
    %24 = vector.broadcast %23 : vector<16x1xf32> to vector<16x256xf32>
    %25 = arith.mulf %24, %1 : vector<16x256xf32>
    %c0_15 = arith.constant 0 : index
    %c0_16 = arith.constant 0 : index
    %c0_17 = arith.constant 0 : index
    %26 = vector.load %arg4[%c0_15, %c0_16, %c0_17] : memref<1x16x256xf32, #tpu.memory_space<vmem>>, vector<1x16x256xf32>
    %27 = vector.shape_cast %26 : vector<1x16x256xf32> to vector<16x256xf32>
    %28 = vector.shape_cast %25 : vector<16x256xf32> to vector<1x16x256xf32>
    tpu.vector_store %arg4[%c0_15, %c0_16, %c0_17], %28 {strides = array<i32>} : memref<1x16x256xf32, #tpu.memory_space<vmem>>, vector<1x16x256xf32>,
    return
  }
  func.func @transform_0(%arg0: i32) -> (i32, i32, i32) {
    %c0_i32 = arith.constant 0 : i32
    %c0_i32_0 = arith.constant 0 : i32
    %c0_i32_1 = arith.constant 0 : i32
    return %arg0, %c0_i32, %c0_i32_0 : i32, i32, i32
  }
  func.func @transform_1(%arg0: i32) -> (i32, i32) {
    %c0_i32 = arith.constant 0 : i32
    %c0_i32_0 = arith.constant 0 : i32
    %c0_i32_1 = arith.constant 0 : i32
    return %c0_i32, %c0_i32_0 : i32, i32
  }
  func.func @transform_2(%arg0: i32) -> (i32, i32) {
    %c0_i32 = arith.constant 0 : i32
    %c0_i32_0 = arith.constant 0 : i32
    %c0_i32_1 = arith.constant 0 : i32
    return %c0_i32, %c0_i32_0 : i32, i32
  }
  func.func @transform_3(%arg0: i32) -> (i32, i32, i32) {
    %c0_i32 = arith.constant 0 : i32
    %c0_i32_0 = arith.constant 0 : i32
    %c0_i32_1 = arith.constant 0 : i32
    return %arg0, %c0_i32, %c0_i32_0 : i32, i32, i32
  }
}

</mosaic_0001>

<bundles_post_ra>
// kernel: tpu_custom_call.1
= control target key start
LH: loop header
LB: loop body
LE: loop exit
PB: predicated region body
PF: predicated region fallthrough
CT: control target
= control target key end

     0   :  { %8 = vsyncpa [#allocation3], 0  ;;  %s833_s0 = inlined_call_operand.hbm [shape: f32[2,16,256], index: 0, kind: input, shape index: {}]   ;;  %s834_s1 = inlined_call_operand.vmem [shape: f32[2,16], index: 1, kind: input, shape index: {}]   ;;  %s835_s2 = inlined_call_operand.vmem [shape: f32[16,2], index: 2, kind: input, shape index: {}]   ;;  %s836_s3 = inlined_call_operand.hbm [shape: f32[2,16,256], index: 3, kind: output, shape index: {}]  }
   0x1   :  { %10 = vsyncpa [#allocation3 + $0x1], 0 }
   0x2   :  { %11 = vsyncpa [#allocation4], 0 }
   0x3   :  { %13 = vsyncpa [#allocation4 + $0x1], 0  ;;  %s673_s12 = smov 0   ;;  %s675_s13 = smov 0  }
   0x4   :  { %s677_s14 = smov 0   ;;  %s679_s15 = smov 0  }
   0x5 LB: > { %s694_s16 = sadd.s32 4294967295, %s646_s15   ;;  %s463_s17 = sadd.s32 4294967294, %s646_s15   ;;  %s646_s15 = sphi %s679_s15, %s846_s15   ;;  %s642_s14 = sphi %s677_s14, %s845_s14   ;;  %s638_s13 = sphi %s675_s13, %s844_s13   ;;  %s634_s12 = sphi %s673_s12, %s843_s12  }
   0x6   : > { %s698_s18 = sadd.s32 1, %s646_s15   ;;  %s26_s19 = sadd.s32 1, %s642_s14 }
   0x7   : > { %s23_s20 = ssub.s32 %s646_s15, %s698_s18  ;;  %p33_p0 = scmp.ne.s32.totalorder %s642_s14, %s638_s13 }
   0x8   : > { %p24_p1 = scmp.eq.s32.totalorder %s23_s20, 0  ;;  %p34_p2 = scmp.eq.s32.totalorder %s646_s15, 0 }
   0x9   : > { %p39_p3 = scmp.ne.s32.totalorder %s638_s13, %s634_s12  ;;  %p40_p4 = scmp.eq.s32.totalorder %s694_s16, 0 }
   0xa   : > { %s710_s21 = scalar_select %p24_p1, %s642_s14, %s26_s19  }
   0xb   : > { %p712_p5 = por %p34_p2, %p33_p0  ;;  %p716_p6 = por %p40_p4, %p39_p3 }
   0xc   : > { %p105_p7 = scmp.eq.s32.totalorder %s694_s16, 1  ;;  %p111_p8 = scmp.eq.s32.totalorder %s463_s17, 1 }
   0xd   : > { %p501_p10 = scmp.lt.s32.totalorder %s646_s15, 2  ;;  %s137_s26 = sand.u32 1, %s642_s14  }
   0xe   : > { %p723_p11 = por %p105_p7, %p33_p0  ;;  %p727_p12 = por %p111_p8, %p39_p3 }
   0xf   : > { %s487_s27 = sshll.u32 %s646_s15, 5  ;;  %s466_s28 = sshll.u32 %s137_s26, 5 }
  0x10   : > { %s146_s4 = scalar_lea.hbm %s833_s0, %s487_s27  ;;  %s141_s6 = scalar_lea.vmem [#allocation2], %s466_s28 }
  0x11   : > { %s147_s5 = sshll.u32 %s146_s4, 4  ;;  %s149_s7 = sshll.u32 %s141_s6, 4  ;;  %s148_s5 = int_to_ptr.hbm [resolvable:$true] %s147_s5  ;;  %s150_s7 = int_to_ptr.vmem [resolvable:$true] %s149_s7 }
  0x12   : > { %p738_p13 = pnand %p501_p10, %p712_p5  ;;  %p469_p0 = scmp.ge.s32.totalorder %s646_s15, 1 }
  0x13   : > { %p157_p1 = scmp.lt.s32.totalorder %s646_s15, 3  ;;  %s138_s9 = scalar_lea.sflag [#allocation3], %s137_s26 }
  0x14   : > { %s550_s10 = sshra.s32 %s148_s5, 4  ;;  %p554_p3 = pneg %p738_p13  ;;  %s551_s10 = int_to_ptr.hbm [resolvable:$true] %s550_s10 }
  0x15   : > { %s552_s11 = scalar_lea.hbm %s551_s10, 32  ;;  %s557_s20 = scalar_lea.hbm %s833_s0, 64 }
  0x16   : > { %p553_p2 = scmp.ne.s32.totalorder %s551_s10, %s552_s11  ;;  %p558_p5 = scmp.lt.s32.totalorder %s551_s10, %s833_s0 }
  0x17   : > { %p559_p8 = scmp.lt.s32.totalorder %s557_s20, %s552_s11 }
  0x18   : > { %p555_p4 = pnand %p554_p3, %p553_p2 }
  0x19   : > { %p560_p10 = por %p559_p8, %p558_p5 }
  0x1a   : > { %p556_p7 = pneg %p555_p4 }
  0x1c   : > { %p561_p9 = pnand %p560_p10, %p556_p7 }
  0x1e   : > { %564 = shalt.err (!%p561_p9)
}
  0x1f   : > { %s648_s26 = smov 256   ;;  %s649_s28 = smov 16  }
  0x20   : > { %496 = dma.hbm_to_vmem [thread:$0]  (!%p738_p13), %s148_s5, 512, %s150_s7, %s138_s9, %s648_s26, %s648_s26, %s649_s28  }
  0x21   : > { %p158_p2 = pnand %p469_p0, %p157_p1 }
  0x22   : > { %s759_s29 = sand.u32 (!%p158_p2), 1, %s638_s13  }
  0x23   : > { %161 = sbr.rel (%p158_p2) target bundleno = 568 (0x238), region = 32  ;;  %s470_s30 = sshll.u32 (!%p158_p2), %s759_s29, 5 }
  0x24   : > { %s164_s4 = scalar_lea.sflag (!%p158_p2), [#allocation3], %s759_s29  ;;  %s167_s6 = scalar_lea.vmem (!%p158_p2), [#allocation2], %s470_s30 }
  0x28   : > { %625 = dma.done.wait (%p716_p6), %s164_s4, 512  }
  0x29   : > { %627 = vsyncadd (%p716_p6), %s164_s4, 4294966784  ;;  %v769_v0 = vld [vmem:[%s167_s6 + $0x10] sm:$0xff]  ;;  %v771_v1 = vld [vmem:[%s167_s6 + $0x18] sm:$0xff]  ;;  %vm212_vm0 = vcmask 130048   ;;  %vm265_vm1 = vcmask 1041408   ;;  %vm258_vm2 = vcmask 15360  }
  0x2a   : > { %v198_v2 = vadd.f32 %v771_v1, %v769_v0  ;;  %v206_v3 = vmax.f32 %v769_v0, %v771_v1  ;;  %v777_v4 = vld [vmem:[%s167_s6] sm:$0xff]  ;;  %v779_v5 = vld [vmem:[%s167_s6 + $0x8] sm:$0xff]  ;;  %v650_v21 = vmov 0   ;;  %s488_s11 = sshll.u32 %s694_s16, 5  ;;  %s190_s17 = scalar_lea.vmem [#allocation5], %s470_s30 }
  0x2b   : > { %v195_v6 = vadd.f32 %v779_v5, %v777_v4  ;;  %v203_v7 = vmax.f32 %v777_v4, %v779_v5  ;;  %v209_v11 = vld [vmem:[%s834_s1] sm:$0x3]  ;;  %v211_v20 = vld [vmem:[%s835_s2 + $0x8] sm:$0xff]  ;;  %540 = vset.pattern.permute.xlu2 %v650_v21  ;;  %541 = vset.pattern.permute.xlu0 %v650_v21  ;;  %s386_s22 = scalar_lea.hbm %s836_s3, %s488_s11  ;;  %s387_s27 = sshll.u32 %s190_s17, 4  ;;  %s388_s27 = int_to_ptr.vmem [resolvable:$true] %s387_s27 }
  0x2c   : > { %199 = vadd.xlane.f32.xlu0 %v198_v2  ;;  %207 = vmax.xlane.f32.xlu1 %v206_v3  ;;  %v210_v17 = vld [vmem:[%s835_s2] sm:$0xff]  ;;  %s389_s26 = sshll.u32 %s386_s22, 4  ;;  %s375_s16 = scalar_lea.sflag [#allocation4], %s759_s29  ;;  %s390_s26 = int_to_ptr.hbm [resolvable:$true] %s389_s26 }
  0x2d   : > { %s594_s28 = sshra.s32 %s390_s26, 4  ;;  %s600_s23 = scalar_lea.hbm %s836_s3, 64  ;;  %s595_s28 = int_to_ptr.hbm [resolvable:$true] %s594_s28 }
  0x2e   : > { %s596_s30 = scalar_lea.hbm %s595_s28, 32  ;;  %p601_p0 = scmp.lt.s32.totalorder %s595_s28, %s836_s3 }
  0x2f   : > { %p597_p6 = scmp.ne.s32.totalorder %s595_s28, %s596_s30  ;;  %p602_p1 = scmp.lt.s32.totalorder %s600_s23, %s596_s30 }
  0x31   : > { %p598_p9 = pnand %p597_p6, %p723_p11  ;;  %p603_p3 = por %p602_p1, %p601_p0 }
  0x33   : > { %p599_p13 = pneg %p598_p9 }
  0x34   : > { %196 = vadd.xlane.f32.xlu0 %v195_v6  ;;  %204 = vmax.xlane.f32.xlu1 %v203_v7 }
  0x35   : > { %p604_p4 = pnand %p603_p3, %p599_p13 }
  0x9f   : > { %v200_v8 = vpop.xlane.xlu0 %199  ;;  %v208_v9 = vpop.xlane.xlu1 %207 }
  0xa0   : > { %v202_v10 = vmul.f32 0.00390625, %v200_v8  ;;  %251 = vmatpush.msra.mxu1 %v208_v9 }
  0xa2   : > { %230 = vmatpush.msra.mxu0 %v202_v10 }
  0xa7   : > { %v197_v12 = vpop.xlane.xlu0 %196  ;;  %v205_v13 = vpop.xlane.xlu1 %204 }
  0xa8   : > { %v201_v14 = vmul.f32 0.00390625, %v197_v12  ;;  %252 = vmatpush.msra.mxu1 %v205_v13 }
  0xa9   : > { %473 = vmatmul.msk.f32.vlgmr.msra.gmra.mxu1 %vm212_vm0, %v209_v11 }
  0xaa   : > { %231 = vmatpush.msra.mxu0 %v201_v14 }
  0xab   : > { %472 = vmatmul.msk.f32.vlgmr.msra.gmra.mxu0 %vm212_vm0, %v209_v11 }
 0x126   : > { %v254_v15 = vpop.f32.mrf.mxu1 }
 0x127   : > { %v257_v16 = vmax.f32 %v254_v15, 0.0 }
 0x128   : > { %v233_v18 = vpop.f32.mrf.mxu0 }
 0x129   : > { %v236_v19 = vmax.f32 %v233_v18, 0.0  ;;  %474 = vmatpush.msk.msra.mxu2 %vm265_vm1, %v257_v16 }
 0x12a   : > { %475 = vmatmul.msk.f32.vlgmr.msra.gmra.mxu2 %vm258_vm2, %v210_v17 }
 0x12b   : > { %477 = vmatpush.msk.msra.mxu3 %vm265_vm1, %v236_v19 }
 0x12c   : > { %478 = vmatmul.msk.f32.vlgmr.msra.gmra.mxu3 %vm258_vm2, %v210_v17 }
 0x132   : > { %476 = vmatmul.msk.f32.gmra.mxu2 %vm258_vm2, %v211_v20 }
 0x134   : > { %479 = vmatmul.msk.f32.gmra.mxu3 %vm258_vm2, %v211_v20 }
 0x1ad   : > { %v286_v22 = vpop.f32.mrf.mxu2 }
 0x1af   : > { %v312_v23 = vpop.f32.mrf.mxu3 }
 0x1b0   : > { %v313_v24 = vadd.f32 %v312_v23, %v286_v22 }
 0x1b2   : > { %v480_v25 = vmul.f32 -1.442695, %v313_v24 }
 0x1b4   : > { %542 = vpow2.f32 %v480_v25 }
 0x1b5   : > { %v289_v26 = vpop.f32.mrf.mxu2 }
 0x1b7   : > { %v315_v27 = vpop.f32.mrf.mxu3 }
 0x1b8   : > { %v316_v28 = vadd.f32 %v315_v27, %v289_v26 }
 0x1ba   : > { %v543_v29 = vpop.eup %542  ;;  %v481_v30 = vmul.f32 -1.442695, %v316_v28 }
 0x1bb   : > { %v324_v31 = vadd.f32 1.0, %v543_v29 }
 0x1bc   : > { %544 = vpow2.f32 %v481_v30 }
 0x1bd   : > { %546 = vrcp.f32 %v324_v31  ;;  %v337_v37 = vand.u32 2147483648, %v324_v31  ;;  %v335_v39 = vand.u32 2147483647, %v324_v31  ;;  %vm331_vm4 = vweird.f32 %v324_v31 }
 0x1bf   : > { %v338_v42 = vor.u32 1.1754944e-38, %v337_v37  ;;  %vm336_vm6 = vcmp.eq.f32.partialorder %v335_v39, 8.507059e+37 }
 0x1c2   : > { %v545_v32 = vpop.eup %544 }
 0x1c3   : > { %v547_v33 = vpop.eup %546  ;;  %v325_v34 = vadd.f32 1.0, %v545_v32 }
 0x1c4   : > { %v327_v35 = vmul.f32 %v547_v33, %v324_v31  ;;  %vm332_vm3 = vweird.f32 %v547_v33 }
 0x1c5   : > { %548 = vrcp.f32 %v325_v34  ;;  %vm333_vm5 = vmor %vm331_vm4, %vm332_vm3  ;;  %v352_v47 = vand.u32 2147483648, %v325_v34  ;;  %v350_v49 = vand.u32 2147483647, %v325_v34  ;;  %vm346_vm8 = vweird.f32 %v325_v34 }
 0x1c6   : > { %v328_v36 = vsub.f32 1.0, %v327_v35 }
 0x1c7   : > { %v353_v51 = vor.u32 1.1754944e-38, %v352_v47  ;;  %vm351_vm10 = vcmp.eq.f32.partialorder %v350_v49, 8.507059e+37 }
 0x1c8   : > { %v329_v38 = vmul.f32 %v547_v33, %v328_v36 }
 0x1ca   : > { %v330_v40 = vadd.f32 %v547_v33, %v329_v38 }
 0x1cb   : > { %v549_v41 = vpop.eup %548 }
 0x1cc   : > { %v334_v43 = vsel %vm333_vm5, %v547_v33, %v330_v40  ;;  %v342_v44 = vmul.f32 %v549_v41, %v325_v34  ;;  %vm347_vm7 = vweird.f32 %v549_v41 }
 0x1cd   : > { %v339_v45 = vsel %vm336_vm6, %v338_v42, %v334_v43  ;;  %vm348_vm9 = vmor %vm346_vm8, %vm347_vm7 }
 0x1ce   : > { %358 = vperm.xlu2 %540, %v339_v45   ;;  %v343_v46 = vsub.f32 1.0, %v342_v44 }
 0x1d0   : > { %v344_v48 = vmul.f32 %v549_v41, %v343_v46 }
 0x1d2   : > { %v345_v50 = vadd.f32 %v549_v41, %v344_v48 }
 0x1d4   : > { %v349_v52 = vsel %vm348_vm9, %v549_v41, %v345_v50 }
 0x1d5   : > { %v354_v53 = vsel %vm351_vm10, %v353_v51, %v349_v52 }
 0x1d6   : > { %363 = vperm.xlu2 %540, %v354_v53  }
 0x228   : > { %v359_v54 = vpop.permute.xlu2 %358 }
 0x229   : > { %v366_v55 = vmul.f32 %v359_v54, %v777_v4  ;;  %v367_v56 = vmul.f32 %v359_v54, %v779_v5 }
 0x22b   : > { %370 = vst [vmem:[%s190_s17] sm:$0xff] %v366_v55 }
 0x22c   : > { %371 = vst [vmem:[%s190_s17 + $0x8] sm:$0xff] %v367_v56 }
 0x230   : > { %v364_v57 = vpop.permute.xlu2 %363 }
 0x231   : > { %v368_v58 = vmul.f32 %v364_v57, %v769_v0  ;;  %v369_v59 = vmul.f32 %v364_v57, %v771_v1 }
 0x233   : > { %372 = vst [vmem:[%s190_s17 + $0x10] sm:$0xff] %v368_v58 }
 0x234   : > { %373 = vst [vmem:[%s190_s17 + $0x18] sm:$0xff] %v369_v59 }
 0x235   : > { %607 = shalt.err (!%p604_p4)
}
 0x236   : > { %s651_s29 = smov 256   ;;  %s652_s8 = smov 16  }
 0x237   : > { %491 = dma.vmem_to_hbm [thread:$0]  (%p723_p11), %s388_s27, 512, %s390_s26, %s375_s16, %s651_s29, %s651_s29, %s652_s8  }
 0x238 PF: > { %s404_s9 = sand.u32 1, %s634_s12   ;;  %p842_p7 = scmp.ge.s32.totalorder %s646_s15, 2 }
 0x239   : > { %s405_s10 = scalar_lea.sflag [#allocation4], %s404_s9 }
 0x23a   : > { %p498_p5 = pnand %p842_p7, %p727_p12 }
 0x23c   : > { %p499_p8 = pneg %p498_p5 }
 0x23e   : > { %629 = dma.done.wait (%p499_p8), %s405_s10, 512  }
 0x23f   : > { %631 = vsyncadd (%p499_p8), %s405_s10, 4294966784  ;;  %p16_p10 = scmp.ge.s32.totalorder %s698_s18, 4   ;;  %s843_s12 = smov %s638_s13 }
 0x240   : > { %s844_s13 = smov %s642_s14  ;;  %s845_s14 = smov %s710_s21 }
 0x241   : > { %s846_s15 = smov %s698_s18  ;;  %18 = sbr.rel (!%p16_p10) target bundleno = 5 (0x5), region = 77 }
 0x246   :  { %411 = vsyncpa [#allocation3], 1 }
 0x247   :  { %413 = vsyncpa [#allocation3 + $0x1], 1 }
 0x248   :  { %414 = vsyncpa [#allocation4], 1 }
 0x249   :  { %416 = vsyncpa [#allocation4 + $0x1], 1 }

</bundles_post_ra>
